<compile_context>
chip_gen: v5e
topology: v5e:2x2
jax: 0.10.0
libtpu: 0.0.40
codegen_flags: <defaults>
</compile_context>

<pallas_src>
import functools

import jax
import jax.numpy as jnp
from jax.experimental import pallas as pl
from jax.experimental.pallas import tpu as pltpu

START_TOKEN = "<START>"
END_TOKEN = "<END>"
PADDING_TOKEN = "<PADDING>"


def _round_up(x, m):
    return ((x + m - 1) // m) * m


# ----------------------------- host-side glue --------------------------------

def build_vocab(sentences):
    chars = sorted(set("".join(sentences)))
    tokens = chars + [START_TOKEN, END_TOKEN, PADDING_TOKEN]
    return {t: i for i, t in enumerate(tokens)}


def batch_tokenize(batch, language_to_index, max_sequence_length,
                   start_token=True, end_token=True):
    """Mirrors SentenceEmbedding.batch_tokenize (char-level tokenization + pad)."""
    rows = []
    for sentence in batch:
        idx = [language_to_index[tok] for tok in list(sentence)]
        if start_token:
            idx.insert(0, language_to_index[START_TOKEN])
        if end_token:
            idx.append(language_to_index[END_TOKEN])
        for _ in range(len(idx), max_sequence_length):
            idx.append(language_to_index[PADDING_TOKEN])
        rows.append(idx)
    return jnp.asarray(rows, dtype=jnp.int32)


def positional_encoding(max_sequence_length, d_model):
    """Standard interleaved sin/cos PositionalEncoding(d_model, max_seq_len)."""
    even_i = jnp.arange(0, d_model, 2, dtype=jnp.float32)
    denominator = jnp.power(10000.0, even_i / d_model)
    position = jnp.arange(max_sequence_length, dtype=jnp.float32)[:, None]
    even_pe = jnp.sin(position / denominator)
    odd_pe = jnp.cos(position / denominator)
    stacked = jnp.stack([even_pe, odd_pe], axis=2)
    return stacked.reshape(max_sequence_length, d_model)


def prepare_embedding_table(emb_table, row_pad=128):
    """Pad vocab rows to a multiple of 128 and cast to bf16 -- ONCE, hoisted out of the
    per-forward jit (this restack/cast is pure per-call overhead otherwise)."""
    V, D = emb_table.shape
    Vpad = _round_up(V, row_pad)
    tab = jnp.zeros((Vpad, D), emb_table.dtype).at[:V].set(emb_table)
    return tab.astype(jnp.bfloat16)
    # TODO(synk): for large vocabularies replace the single-hot GEMM gather below with a
    # true gather (jnp.take on the VMEM table) and keep the table f32 for strict parity.


# ----------------------------- Pallas kernel --------------------------------

def _make_kernel(tile_s, Vpad, D, dropout_p, training):
    keep_prob = 1.0 - float(dropout_p)
    apply_dropout = bool(training) and float(dropout_p) > 0.0
    inv_keep = float(1.0 / keep_prob) if apply_dropout else 1.0
    # keep  <=>  uint8 random value < keep_prob * 256.  Plain Python int: a jnp scalar
    # here would be captured as a kernel constant (the previous compile failure).
    threshold = min(int(round(keep_prob * 256.0)), 255)

    def kernel(ids_ref, pos_ref, tab_ref, *rest):
        if apply_dropout:
            bits_ref, out_ref = rest
        else:
            (out_ref,) = rest

        ids = ids_ref[...].reshape(tile_s, 1)            # [tile_s, 1] int32 token ids

        # Single-hot gather over the (small) padded vocab: one MXU GEMM, K = Vpad only.
        iota_v = jax.lax.broadcasted_iota(jnp.int32, (tile_s, Vpad), 1)
        onehot = (iota_v == ids).astype(jnp.bfloat16)    # [tile_s, Vpad]
        x = jnp.dot(onehot, tab_ref[...],
                    preferred_element_type=jnp.float32)  # [tile_s, D] f32

        # Positional encoding added on the VPU (exact f32).
        x = x + pos_ref[...]

        if apply_dropout:
            keep = bits_ref[...].reshape(tile_s, D) < threshold
            x = jnp.where(keep, x * inv_keep, 0.0)

        out_ref[...] = x.reshape(1, tile_s, D)

    return kernel


@functools.partial(jax.jit,
                   static_argnames=("dropout_p", "training", "seq_tile"))
def sentence_embedding_forward(ids, tab_padded, pos_enc, rng_key,
                               dropout_p=0.1, training=True, seq_tile=512):
    """ids [B,S] i32, tab_padded [Vpad,D] bf16 (from prepare_embedding_table),
    pos_enc [S,D] f32  ->  [B,S,D] f32."""
    B, S = ids.shape
    Vpad, D = tab_padded.shape
    apply_dropout = bool(training) and float(dropout_p) > 0.0

    s8 = _round_up(S, 8)
    if s8 <= int(seq_tile):
        tile_s = s8                              # whole sequence in one tile (demo: 200)
    else:
        tile_s = _round_up(int(seq_tile), 32)    # 32: uint8 dropout-bits sublane tiling
    Spad = _round_up(S, tile_s)

    ids3 = ids.astype(jnp.int32).reshape(B, S, 1)
    pos_p = pos_enc.astype(jnp.float32)
    if Spad != S:
        ids3 = jnp.pad(ids3, ((0, 0), (0, Spad - S), (0, 0)))
        pos_p = jnp.pad(pos_p, ((0, Spad - S), (0, 0)))

    grid = (Spad // tile_s, B)                   # demo: (1, 2) -> 2 parallel steps
    in_specs = [
        pl.BlockSpec((1, tile_s, 1), lambda i, b: (b, i, 0)),   # token ids
        pl.BlockSpec((tile_s, D), lambda i, b: (i, 0)),         # pos-enc tile (revisited over b)
        pl.BlockSpec((Vpad, D), lambda i, b: (0, 0)),           # bf16 table, VMEM-resident
    ]
    args = [ids3, pos_p, tab_padded]
    if apply_dropout:
        # TODO(synk): replace with in-kernel pltpu.prng_seed / pltpu.prng_random_bits
        # (seed mixed with pl.program_id) on real-TPU-only runs; no interpret lowering.
        bits = jax.random.bits(rng_key, (B, Spad, D), dtype=jnp.uint8)
        in_specs.append(pl.BlockSpec((1, tile_s, D), lambda i, b: (b, i, 0)))
        args.append(bits)

    kernel = _make_kernel(tile_s, Vpad, D, dropout_p, training)
    out = pl.pallas_call(
        kernel,
        out_shape=jax.ShapeDtypeStruct((B, Spad, D), jnp.float32),
        grid_spec=pltpu.PrefetchScalarGridSpec(
            num_scalar_prefetch=0,
            grid=grid,
            in_specs=in_specs,
            out_specs=pl.BlockSpec((1, tile_s, D), lambda i, b: (b, i, 0)),
        ),
        compiler_params=pltpu.CompilerParams(
            dimension_semantics=("parallel", "parallel"),
            vmem_limit_bytes=32 * 1024 * 1024,
        ),
    )(*args)

    if Spad != S:
        out = out[:, :S, :]
    return out


# --------------------------------- demo --------------------------------------

if __name__ == "__main__":
    max_sequence_length = 200          # module default
    d_model = 64
    batch = ["should we go to the mall?",
             "the quick brown fox jumps over the lazy dog"]

    language_to_index = build_vocab(batch)
    V = len(language_to_index)

    key = jax.random.PRNGKey(0)
    k_emb, k_drop = jax.random.split(key)
    emb_table = jax.random.normal(k_emb, (V, d_model), jnp.float32)

    ids = batch_tokenize(batch, language_to_index, max_sequence_length,
                         start_token=True, end_token=True)       # [2, 200] int32
    pos = positional_encoding(max_sequence_length, d_model)      # [200, 64] f32
    tab_padded = prepare_embedding_table(emb_table)              # [128, 64] bf16 (once)

    # Reference: embedding rows go through the MXU as bf16 (exact single-hot gather of
    # the bf16 row); positional add and dropout stay f32.
    emb_bf = emb_table.astype(jnp.bfloat16).astype(jnp.float32)
    ref = emb_bf[ids] + pos[None, :, :]

    # Eval mode (dropout disabled) -- deterministic correctness check.
    out_eval = sentence_embedding_forward(ids, tab_padded, pos, k_drop,
                                          dropout_p=0.1, training=False)
    jax.block_until_ready(out_eval)
    assert out_eval.shape == (2, max_sequence_length, d_model)
    assert jnp.allclose(out_eval, ref, atol=1e-5, rtol=1e-5), "eval-mode mismatch"

    # Training mode: dropout p=0.1, kept elements scaled by 1/keep_prob.
    out_train = sentence_embedding_forward(ids, tab_padded, pos, k_drop,
                                           dropout_p=0.1, training=True)
    jax.block_until_ready(out_train)
    assert out_train.shape == (2, max_sequence_length, d_model)
    keep_prob = 0.9
    scaled = ref / keep_prob
    is_dropped = jnp.isclose(out_train, 0.0, atol=1e-6)
    is_kept = jnp.isclose(out_train, scaled, atol=1e-4, rtol=1e-4)
    assert bool(jnp.all(is_dropped | is_kept)), "training-mode dropout mismatch"
    frac_kept = float(jnp.mean(is_kept.astype(jnp.float32)))
    # uint8 threshold 230/256 ~= 0.898 expected keep fraction (documented small bias).
    assert 0.85 < frac_kept < 0.95, f"dropout keep fraction off: {frac_kept}"

    print("KERNEL_OK")
</pallas_src>

<mosaic_0001>
module attributes {stable_mosaic.version = 11 : i64} {
  func.func @kernel(%arg0: i32, %arg1: i32, %arg2: memref<1x200x1xi32, #tpu.memory_space<vmem>>, %arg3: memref<200x64xf32, #tpu.memory_space<vmem>>, %arg4: memref<128x64xbf16, #tpu.memory_space<vmem>>, %arg5: memref<1x200x64xf32, #tpu.memory_space<vmem>>) attributes {dimension_semantics = [#tpu.dimension_semantics<parallel>, #tpu.dimension_semantics<parallel>], iteration_bounds = array<i64: 1, 2>, scalar_prefetch = 0 : i64, scratch_operands = 0 : i64, tpu.core_type = #tpu.core_type<tc>, window_params = [{transform_indices = @transform_0, window_bounds = array<i64: 1, 200, 1>}, {transform_indices = @transform_1, window_bounds = array<i64: 200, 64>}, {pipeline_mode = #tpu.pipeline_mode<synchronous>, transform_indices = @transform_2, window_bounds = array<i64: 128, 64>}, {transform_indices = @transform_3, window_bounds = array<i64: 1, 200, 64>}]} {
    %c0 = arith.constant 0 : index
    %c0_0 = arith.constant 0 : index
    %c0_1 = arith.constant 0 : index
    %0 = vector.load %arg2[%c0, %c0_0, %c0_1] : memref<1x200x1xi32, #tpu.memory_space<vmem>>, vector<1x200x1xi32>
    %1 = vector.shape_cast %0 : vector<1x200x1xi32> to vector<200x1xi32>
    %2 = tpu.iota {dimensions = array<i32: 1>} : vector<200x128xi32>
    %3 = vector.broadcast %1 : vector<200x1xi32> to vector<200x128xi32>
    %4 = arith.cmpi eq, %2, %3 : vector<200x128xi32>
    %5 = arith.extui %4 : vector<200x128xi1> to vector<200x128xi32>
    %6 = arith.sitofp %5 : vector<200x128xi32> to vector<200x128xf32>
    %7 = arith.truncf %6 : vector<200x128xf32> to vector<200x128xbf16>
    %c0_2 = arith.constant 0 : index
    %c0_3 = arith.constant 0 : index
    %8 = vector.load %arg4[%c0_2, %c0_3] : memref<128x64xbf16, #tpu.memory_space<vmem>>, vector<128x64xbf16>
    %cst = arith.constant dense<0.000000e+00> : vector<200x64xf32>
    %9 = tpu.matmul %7, %8, %cst {dimension_numbers = #tpu.dot_dimension_numbers<[1], [0], [0], [1], [0, 0, 1, 1], [], []>} : vector<200x128xbf16>, vector<128x64xbf16>, vector<200x64xf32> -> vector<200x64xf32>
    %c0_4 = arith.constant 0 : index
    %c0_5 = arith.constant 0 : index
    %10 = vector.load %arg3[%c0_4, %c0_5] : memref<200x64xf32, #tpu.memory_space<vmem>>, vector<200x64xf32>
    %11 = arith.addf %9, %10 : vector<200x64xf32>
    %12 = vector.shape_cast %11 : vector<200x64xf32> to vector<1x200x64xf32>
    %c0_6 = arith.constant 0 : index
    %c0_7 = arith.constant 0 : index
    %c0_8 = arith.constant 0 : index
    %13 = vector.load %arg5[%c0_6, %c0_7, %c0_8] : memref<1x200x64xf32, #tpu.memory_space<vmem>>, vector<1x200x64xf32>
    tpu.vector_store %arg5[%c0_6, %c0_7, %c0_8], %12 {strides = array<i32>} : memref<1x200x64xf32, #tpu.memory_space<vmem>>, vector<1x200x64xf32>,
    return
  }
  func.func @transform_0(%arg0: i32, %arg1: i32) -> (i32, i32, i32) {
    %c0_i32 = arith.constant 0 : i32
    %c0_i32_0 = arith.constant 0 : i32
    return %arg1, %arg0, %c0_i32 : i32, i32, i32
  }
  func.func @transform_1(%arg0: i32, %arg1: i32) -> (i32, i32) {
    %c0_i32 = arith.constant 0 : i32
    %c0_i32_0 = arith.constant 0 : i32
    return %arg0, %c0_i32 : i32, i32
  }
  func.func @transform_2(%arg0: i32, %arg1: i32) -> (i32, i32) {
    %c0_i32 = arith.constant 0 : i32
    %c0_i32_0 = arith.constant 0 : i32
    %c0_i32_1 = arith.constant 0 : i32
    return %c0_i32, %c0_i32_0 : i32, i32
  }
  func.func @transform_3(%arg0: i32, %arg1: i32) -> (i32, i32, i32) {
    %c0_i32 = arith.constant 0 : i32
    %c0_i32_0 = arith.constant 0 : i32
    return %arg1, %arg0, %c0_i32 : i32, i32, i32
  }
}

</mosaic_0001>

<bundles_post_ra>
// kernel: sentence_embedding_forward.1
= control target key start
LH: loop header
LB: loop body
LE: loop exit
PB: predicated region body
PF: predicated region fallthrough
CT: control target
= control target key end

     0   :  { %s913_s12 = smov 0   ;;  %s915_s13 = smov 0   ;;  %s1171_s0 = inlined_call_operand.vmem [shape: s32[2,200,1], index: 0, kind: input, shape index: {}]   ;;  %s1172_s1 = inlined_call_operand.vmem [shape: f32[200,64], index: 1, kind: input, shape index: {}]   ;;  %s1173_s2 = inlined_call_operand.vmem [shape: bf16[128,64], index: 2, kind: input, shape index: {}]   ;;  %s1174_s3 = inlined_call_operand.vmem [shape: f32[2,200,64], index: 3, kind: output, shape index: {}]  }
   0x1   :  { %s917_s14 = smov 0  }
   0x2 LB: > { %s22_s15 = sadd.s32 1, %s885_s13  ;;  %p717_p0 = scmp.ge.s32.totalorder %s889_s14, 1  ;;  %s889_s14 = sphi %s917_s14, %s13_s14   ;;  %s885_s13 = sphi %s915_s13, %s1176_s13   ;;  %s881_s12 = sphi %s913_s12, %s1175_s12  }
   0x3   : > { %p23_p1 = scmp.ge.s32.totalorder %s22_s15, 2  ;;  %p169_p2 = scmp.lt.s32.totalorder %s889_s14, 3 }
   0x5   : > { %s1178_s15 = smov (%p23_p1, %s22_s15), 0  ;;  %p170_p3 = pnand %p717_p0, %p169_p2 }
   0x6   : > { %p207_p4 = scmp.lt.s32.totalorder (!%p170_p3), %s881_s12, 1 }
   0x7   : > { %173 = sbr.rel (%p170_p3) target bundleno = 336 (0x150), region = 32 }
   0xc   : > { %v891_v0 = vmov 0   ;;  %s1180_s12 = smov (!%p207_p4, %s881_s12), 1  ;;  %v812_v16 = vld [vmem:[%s1173_s2 + $0x38] sm:$0xff]  ;;  %v811_v17 = vld [vmem:[%s1173_s2 + $0x30] sm:$0xff]  ;;  %v810_v27 = vld [vmem:[%s1173_s2 + $0x28] sm:$0xff]  ;;  %v257_v34 = vlaneseq }
   0xd   : > { %866 = vset.pattern.permute.xlu2 %v891_v0  ;;  %865 = vset.pattern.permute.xlu1 %v891_v0  ;;  %s837_s16 = smul.u32 200, %s1180_s12  ;;  %v809_v28 = vld [vmem:[%s1173_s2 + $0x20] sm:$0xff]  ;;  %v808_v30 = vld [vmem:[%s1173_s2 + $0x18] sm:$0xff]  ;;  %v807_v31 = vld [vmem:[%s1173_s2 + $0x10] sm:$0xff]  ;;  %v892_v38 = vmov 1.0|1.0  }
   0xe   : > { %864 = vset.pattern.permute.xlu0 %v891_v0  ;;  %815 = vmatpush.bf16.msra.mxu3 %v812_v16  ;;  %v806_v32 = vld [vmem:[%s1173_s2 + $0x8] sm:$0xff]  ;;  %v805_v33 = vld [vmem:[%s1173_s2] sm:$0xff]  ;;  %v990_v36 = vand.u32 127, %v257_v34 }
   0xf   : > { %s939_s19 = scalar_lea.vmem %s1171_s0, %s837_s16  ;;  %814 = vmatpush.bf16.msra.mxu2 %v812_v16  ;;  %511 = vmatpush.bf16.msra.mxu0 %v812_v16  ;;  %v458_v62 = vld [vmem:[%s1172_s1 + $0xa0] sm:$0xff]  ;;  %s1038_s18 = scalar_lea.vmem %s1174_s3, %s837_s16 }
  0x10   : > { %v252_v1 = vld [vmem:[%s939_s19 + $0xa0] sm:$0xff]  ;;  %v246_v2 = vld [vmem:[%s939_s19 + $0x70] sm:$0xff]  ;;  %v253_v4 = vld [vmem:[%s939_s19 + $0xa8] sm:$0xff]  ;;  %813 = vmatpush.bf16.msra.mxu1 %v812_v16 }
  0x11   : > { %v244_v3 = vld [vmem:[%s939_s19 + $0x60] sm:$0xff]  ;;  %320 = vperm.xlu2 %866, %v252_v1   ;;  %302 = vperm.xlu1 %865, %v246_v2   ;;  %v247_v5 = vld [vmem:[%s939_s19 + $0x78] sm:$0xff]  ;;  %v245_v6 = vld [vmem:[%s939_s19 + $0x68] sm:$0xff] }
  0x12   : > { %296 = vperm.xlu0 %864, %v244_v3   ;;  %v238_v7 = vld [vmem:[%s939_s19 + $0x30] sm:$0xff]  ;;  %v233_v8 = vld [vmem:[%s939_s19 + $0x8] sm:$0xff]  ;;  %v232_v9 = vld [vmem:[%s939_s19] sm:$0xff]  ;;  %818 = vmatpush.bf16.msra.mxu3 %v811_v17 }
  0x13   : > { %v249_v10 = vld [vmem:[%s939_s19 + $0x88] sm:$0xff]  ;;  %v248_v11 = vld [vmem:[%s939_s19 + $0x80] sm:$0xff]  ;;  %v239_v12 = vld [vmem:[%s939_s19 + $0x38] sm:$0xff]  ;;  %817 = vmatpush.bf16.msra.mxu2 %v811_v17  ;;  %512 = vmatpush.bf16.msra.mxu0 %v811_v17 }
  0x14   : > { %v234_v13 = vld [vmem:[%s939_s19 + $0x10] sm:$0xff]  ;;  %v255_v14 = vld [vmem:[%s939_s19 + $0xb8] sm:$0xff]  ;;  %v241_v18 = vld [vmem:[%s939_s19 + $0x48] sm:$0xff]  ;;  %816 = vmatpush.bf16.msra.mxu1 %v811_v17 }
  0x15   : > { %v254_v15 = vld [vmem:[%s939_s19 + $0xb0] sm:$0xff]  ;;  %v240_v19 = vld [vmem:[%s939_s19 + $0x40] sm:$0xff]  ;;  %v235_v20 = vld [vmem:[%s939_s19 + $0x18] sm:$0xff] }
  0x16   : > { %v256_v21 = vld [vmem:[%s939_s19 + $0xc0] sm:$0xff]  ;;  %v251_v22 = vld [vmem:[%s939_s19 + $0x98] sm:$0xff]  ;;  %v250_v23 = vld [vmem:[%s939_s19 + $0x90] sm:$0xff]  ;;  %821 = vmatpush.bf16.msra.mxu3 %v810_v27 }
  0x17   : > { %v242_v24 = vld [vmem:[%s939_s19 + $0x50] sm:$0xff]  ;;  %v237_v25 = vld [vmem:[%s939_s19 + $0x28] sm:$0xff]  ;;  %v236_v26 = vld [vmem:[%s939_s19 + $0x20] sm:$0xff]  ;;  %820 = vmatpush.bf16.msra.mxu2 %v810_v27  ;;  %513 = vmatpush.bf16.msra.mxu0 %v810_v27 }
  0x18   : > { %v243_v29 = vld [vmem:[%s939_s19 + $0x58] sm:$0xff]  ;;  %819 = vmatpush.bf16.msra.mxu1 %v810_v27  ;;  %v459_v1 = vld [vmem:[%s1172_s1 + $0xa8] sm:$0xff] }
  0x19   : > { %323 = vperm.xlu2 %866, %v253_v4   ;;  %305 = vperm.xlu1 %865, %v247_v5   ;;  %v450_v4 = vld [vmem:[%s1172_s1 + $0x60] sm:$0xff] }
  0x1a   : > { %299 = vperm.xlu0 %864, %v245_v6   ;;  %824 = vmatpush.bf16.msra.mxu3 %v809_v28  ;;  %v438_v6 = vld [vmem:[%s1172_s1] sm:$0xff] }
  0x1b   : > { %823 = vmatpush.bf16.msra.mxu2 %v809_v28  ;;  %514 = vmatpush.bf16.msra.mxu0 %v809_v28 }
  0x1c   : > { %822 = vmatpush.bf16.msra.mxu1 %v809_v28 }
  0x1e   : > { %827 = vmatpush.bf16.msra.mxu3 %v808_v30 }
  0x1f   : > { %826 = vmatpush.bf16.msra.mxu2 %v808_v30  ;;  %515 = vmatpush.bf16.msra.mxu0 %v808_v30 }
  0x20   : > { %825 = vmatpush.bf16.msra.mxu1 %v808_v30 }
  0x21   : > { %278 = vperm.xlu2 %866, %v238_v7   ;;  %263 = vperm.xlu1 %865, %v233_v8  }
  0x22   : > { %260 = vperm.xlu0 %864, %v232_v9   ;;  %830 = vmatpush.bf16.msra.mxu3 %v807_v31 }
  0x23   : > { %829 = vmatpush.bf16.msra.mxu2 %v807_v31  ;;  %516 = vmatpush.bf16.msra.mxu0 %v807_v31 }
  0x24   : > { %828 = vmatpush.bf16.msra.mxu1 %v807_v31 }
  0x26   : > { %833 = vmatpush.bf16.msra.mxu3 %v806_v32 }
  0x27   : > { %832 = vmatpush.bf16.msra.mxu2 %v806_v32  ;;  %517 = vmatpush.bf16.msra.mxu0 %v806_v32 }
  0x28   : > { %831 = vmatpush.bf16.msra.mxu1 %v806_v32  ;;  %v446_v32 = vld [vmem:[%s1172_s1 + $0x40] sm:$0xff] }
  0x29   : > { %311 = vperm.xlu2 %866, %v249_v10   ;;  %308 = vperm.xlu1 %865, %v248_v11   ;;  %v451_v10 = vld [vmem:[%s1172_s1 + $0x68] sm:$0xff] }
  0x2a   : > { %281 = vperm.xlu0 %864, %v239_v12   ;;  %836 = vmatpush.bf16.msra.mxu3 %v805_v33  ;;  %v439_v12 = vld [vmem:[%s1172_s1 + $0x8] sm:$0xff] }
  0x2b   : > { %835 = vmatpush.bf16.msra.mxu2 %v805_v33  ;;  %518 = vmatpush.bf16.msra.mxu0 %v805_v33 }
  0x2c   : > { %834 = vmatpush.bf16.msra.mxu1 %v805_v33 }
  0x31   : > { %266 = vperm.xlu2 %866, %v234_v13   ;;  %329 = vperm.xlu1 %865, %v255_v14   ;;  %v444_v14 = vld [vmem:[%s1172_s1 + $0x30] sm:$0xff] }
  0x32   : > { %326 = vperm.xlu0 %864, %v254_v15  }
  0x39   : > { %287 = vperm.xlu2 %866, %v241_v18   ;;  %284 = vperm.xlu1 %865, %v240_v19   ;;  %v452_v19 = vld [vmem:[%s1172_s1 + $0x70] sm:$0xff] }
  0x3a   : > { %269 = vperm.xlu0 %864, %v235_v20  }
  0x41   : > { %332 = vperm.xlu2 %866, %v256_v21   ;;  %317 = vperm.xlu1 %865, %v251_v22   ;;  %v445_v22 = vld [vmem:[%s1172_s1 + $0x38] sm:$0xff] }
  0x42   : > { %314 = vperm.xlu0 %864, %v250_v23  }
  0x49   : > { %290 = vperm.xlu2 %866, %v242_v24   ;;  %275 = vperm.xlu1 %865, %v237_v25   ;;  %v453_v25 = vld [vmem:[%s1172_s1 + $0x78] sm:$0xff] }
  0x4a   : > { %272 = vperm.xlu0 %864, %v236_v26   ;;  %v460_v26 = vld [vmem:[%s1172_s1 + $0xb0] sm:$0xff] }
  0x52   : > { %293 = vperm.xlu0 %864, %v243_v29   ;;  %v440_v29 = vld [vmem:[%s1172_s1 + $0x10] sm:$0xff] }
  0x6b   : > { %v321_v35 = vpop.permute.xlu2 %320 }
  0x6c   : > { %vm354_vm0 = vcmp.eq.s32.totalorder %v990_v36, %v321_v35 }
  0x73   : > { %v324_v37 = vpop.permute.xlu2 %323 }
  0x74   : > { %vm355_vm1 = vcmp.eq.s32.totalorder %v990_v36, %v324_v37  ;;  %v454_v37 = vld [vmem:[%s1172_s1 + $0x80] sm:$0xff] }
  0x75   : > { %vm797_vm2 = vmpackc.low %vm355_vm1, %vm354_vm0 }
  0x76   : > { %798 = vmatmul.msk.bf16.vlgmr.msra.gmra.mxu3 %vm797_vm2, %v892_v38 }
  0x7b   : > { %v279_v41 = vpop.permute.xlu2 %278 }
  0x7c   : > { %vm340_vm12 = vcmp.eq.s32.totalorder %v990_v36, %v279_v41  ;;  %v441_v41 = vld [vmem:[%s1172_s1 + $0x18] sm:$0xff] }
  0x83   : > { %v303_v39 = vpop.permute.xlu1 %302  ;;  %v312_v44 = vpop.permute.xlu2 %311 }
  0x84   : > { %v297_v40 = vpop.permute.xlu0 %296  ;;  %vm348_vm9 = vcmp.eq.s32.totalorder %v990_v36, %v303_v39 }
  0x85   : > { %vm346_vm3 = vcmp.eq.s32.totalorder %v990_v36, %v297_v40 }
  0x8b   : > { %v306_v42 = vpop.permute.xlu1 %305  ;;  %v267_v48 = vpop.permute.xlu2 %266 }
  0x8c   : > { %v300_v43 = vpop.permute.xlu0 %299  ;;  %vm349_vm10 = vcmp.eq.s32.totalorder %v990_v36, %v306_v42 }
  0x8d   : > { %vm347_vm4 = vcmp.eq.s32.totalorder %v990_v36, %v300_v43  ;;  %vm791_vm13 = vmpackc.low %vm349_vm10, %vm348_vm9 }
  0x8e   : > { %vm789_vm5 = vmpackc.low %vm347_vm4, %vm346_vm3  ;;  %vm351_vm3 = vcmp.eq.s32.totalorder %v990_v36, %v312_v44  ;;  %v447_v44 = vld [vmem:[%s1172_s1 + $0x48] sm:$0xff] }
  0x8f   : > { %790 = vmatmul.msk.bf16.vlgmr.msra.gmra.mxu2 %vm789_vm5, %v892_v38 }
  0x93   : > { %v264_v45 = vpop.permute.xlu1 %263  ;;  %v288_v52 = vpop.permute.xlu2 %287 }
  0x94   : > { %vm335_vm6 = vcmp.eq.s32.totalorder %v990_v36, %v264_v45  ;;  %v261_v46 = vpop.permute.xlu0 %260  ;;  %vm343_vm4 = vcmp.eq.s32.totalorder %v990_v36, %v288_v52 }
  0x95   : > { %vm334_vm7 = vcmp.eq.s32.totalorder %v990_v36, %v261_v46 }
  0x96   : > { %vm777_vm8 = vmpackc.low %vm335_vm6, %vm334_vm7  ;;  %vm336_vm7 = vcmp.eq.s32.totalorder %v990_v36, %v267_v48 }
  0x97   : > { %778 = vmatmul.msk.bf16.vlgmr.msra.gmra.mxu0 %vm777_vm8, %v892_v38 }
  0x9b   : > { %v309_v47 = vpop.permute.xlu1 %308  ;;  %v333_v55 = vpop.permute.xlu2 %332 }
  0x9c   : > { %v282_v49 = vpop.permute.xlu0 %281  ;;  %vm350_vm2 = vcmp.eq.s32.totalorder %v990_v36, %v309_v47 }
  0x9d   : > { %vm341_vm11 = vcmp.eq.s32.totalorder %v990_v36, %v282_v49  ;;  %vm793_vm5 = vmpackc.low %vm351_vm3, %vm350_vm2  ;;  %v455_v49 = vld [vmem:[%s1172_s1 + $0x88] sm:$0xff] }
  0x9e   : > { %vm783_vm14 = vmpackc.low %vm341_vm11, %vm340_vm12  ;;  %vm358_vm11 = vcmp.eq.s32.totalorder %v990_v36, %v333_v55 }
  0x9f   : > { %792 = vmatmul.msk.bf16.gmra.mxu2 %vm791_vm13, %v892_v38  ;;  %784 = vmatmul.msk.bf16.vlgmr.msra.gmra.mxu1 %vm783_vm14, %v892_v38  ;;  %vm801_vm12 = vmpackc.low %vm358_vm11, %vm358_vm11 }
  0xa3   : > { %v330_v50 = vpop.permute.xlu1 %329  ;;  %v291_v60 = vpop.permute.xlu2 %290 }
  0xa4   : > { %vm357_vm15 = vcmp.eq.s32.totalorder %v990_v36, %v330_v50  ;;  %v327_v51 = vpop.permute.xlu0 %326  ;;  %vm344_vm3 = vcmp.eq.s32.totalorder %v990_v36, %v291_v60  ;;  %v462_v50 = vld [vmem:[%s1172_s1 + $0xc0] sm:$0xff] }
  0xa5   : > { %vm356_vm0 = vcmp.eq.s32.totalorder %v990_v36, %v327_v51 }
  0xa6   : > { %vm799_vm1 = vmpackc.low %vm357_vm15, %vm356_vm0 }
  0xa7   : > { %800 = vmatmul.msk.bf16.gmra.mxu3 %vm799_vm1, %v892_v38 }
  0xab   : > { %v285_v53 = vpop.permute.xlu1 %284 }
  0xac   : > { %vm342_vm6 = vcmp.eq.s32.totalorder %v990_v36, %v285_v53  ;;  %v270_v54 = vpop.permute.xlu0 %269  ;;  %v442_v53 = vld [vmem:[%s1172_s1 + $0x20] sm:$0xff] }
  0xad   : > { %vm785_vm8 = vmpackc.low %vm343_vm4, %vm342_vm6  ;;  %vm337_vm9 = vcmp.eq.s32.totalorder %v990_v36, %v270_v54  ;;  %vm584_vm6 = vcmask 523264  }
  0xae   : > { %vm779_vm10 = vmpackc.low %vm337_vm9, %vm336_vm7 }
  0xaf   : > { %780 = vmatmul.msk.bf16.gmra.mxu0 %vm779_vm10, %v892_v38  ;;  %794 = vmatmul.msk.bf16.gmra.mxu2 %vm793_vm5, %v892_v38 }
  0xb0   : > { %786 = vmatmul.msk.bf16.gmra.mxu1 %vm785_vm8, %v892_v38 }
  0xb3   : > { %v318_v56 = vpop.permute.xlu1 %317 }
  0xb4   : > { %v315_v57 = vpop.permute.xlu0 %314  ;;  %vm353_vm13 = vcmp.eq.s32.totalorder %v990_v36, %v318_v56 }
  0xb5   : > { %vm352_vm14 = vcmp.eq.s32.totalorder %v990_v36, %v315_v57 }
  0xb6   : > { %vm795_vm0 = vmpackc.low %vm353_vm13, %vm352_vm14 }
  0xb7   : > { %802 = vmatmul.msk.bf16.gmra.mxu3 %vm801_vm12, %v892_v38 }
  0xbb   : > { %v276_v58 = vpop.permute.xlu1 %275 }
  0xbc   : > { %vm339_vm15 = vcmp.eq.s32.totalorder %v990_v36, %v276_v58  ;;  %v273_v59 = vpop.permute.xlu0 %272  ;;  %v456_v58 = vld [vmem:[%s1172_s1 + $0x90] sm:$0xff] }
  0xbd   : > { %vm338_vm1 = vcmp.eq.s32.totalorder %v990_v36, %v273_v59 }
  0xbe   : > { %vm781_vm2 = vmpackc.low %vm339_vm15, %vm338_vm1 }
  0xbf   : > { %782 = vmatmul.msk.bf16.gmra.mxu0 %vm781_vm2, %v892_v38  ;;  %796 = vmatmul.msk.bf16.gmra.mxu2 %vm795_vm0, %v892_v38 }
  0xc4   : > { %v294_v61 = vpop.permute.xlu0 %293 }
  0xc5   : > { %vm345_vm4 = vcmp.eq.s32.totalorder %v990_v36, %v294_v61  ;;  %v443_v61 = vld [vmem:[%s1172_s1 + $0x28] sm:$0xff] }
  0xc6   : > { %vm787_vm5 = vmpackc.low %vm345_vm4, %vm344_vm3 }
  0xc7   : > { %788 = vmatmul.msk.bf16.gmra.mxu1 %vm787_vm5, %v892_v38  ;;  %v461_v38 = vld [vmem:[%s1172_s1 + $0xb8] sm:$0xff] }
  0xf9   : > { %v570_v63 = vpop.f32.mrf.mxu3 }
  0xfa   : > { %v571_v0 = vadd.f32 %v570_v63, %v458_v62  ;;  %v448_v62 = vld [vmem:[%s1172_s1 + $0x50] sm:$0xff] }
  0xfc   : > { %605 = vst.msk [vmem:[%s1038_s18 + $0xa0] sm:$0xff] %vm584_vm6, %v571_v0 }
 0x101   : > { %v572_v2 = vpop.f32.mrf.mxu3 }
 0x102   : > { %v573_v3 = vadd.f32 %v572_v2, %v459_v1 }
 0x104   : > { %606 = vst.msk [vmem:[%s1038_s18 + $0xa8] sm:$0xff] %vm584_vm6, %v573_v3 }
 0x112   : > { %v550_v5 = vpop.f32.mrf.mxu2 }
 0x113   : > { %v551_v7 = vadd.f32 %v550_v5, %v450_v4  ;;  %v457_v4 = vld [vmem:[%s1172_s1 + $0x98] sm:$0xff] }
 0x114   : > { %v520_v8 = vpop.f32.mrf.mxu0 }
 0x115   : > { %597 = vst.msk [vmem:[%s1038_s18 + $0x60] sm:$0xff] %vm584_vm6, %v551_v7  ;;  %v521_v9 = vadd.f32 %v520_v8, %v438_v6  ;;  %v449_v6 = vld [vmem:[%s1172_s1 + $0x58] sm:$0xff] }
 0x117   : > { %585 = vst.msk [vmem:[%s1038_s18] sm:$0xff] %vm584_vm6, %v521_v9 }
 0x11a   : > { %v552_v11 = vpop.f32.mrf.mxu2 }
 0x11b   : > { %v553_v13 = vadd.f32 %v552_v11, %v451_v10 }
 0x11c   : > { %v522_v15 = vpop.f32.mrf.mxu0  ;;  %v535_v17 = vpop.f32.mrf.mxu1 }
 0x11d   : > { %598 = vst.msk [vmem:[%s1038_s18 + $0x68] sm:$0xff] %vm584_vm6, %v553_v13  ;;  %v523_v16 = vadd.f32 %v522_v15, %v439_v12  ;;  %v536_v18 = vadd.f32 %v535_v17, %v444_v14 }
 0x11f   : > { %586 = vst.msk [vmem:[%s1038_s18 + $0x8] sm:$0xff] %vm584_vm6, %v523_v16 }
 0x120   : > { %591 = vst.msk [vmem:[%s1038_s18 + $0x30] sm:$0xff] %vm584_vm6, %v536_v18 }
 0x122   : > { %v555_v20 = vpop.f32.mrf.mxu2 }
 0x123   : > { %v556_v21 = vadd.f32 %v555_v20, %v452_v19 }
 0x124   : > { %v537_v23 = vpop.f32.mrf.mxu1 }
 0x125   : > { %599 = vst.msk [vmem:[%s1038_s18 + $0x70] sm:$0xff] %vm584_vm6, %v556_v21  ;;  %v538_v24 = vadd.f32 %v537_v23, %v445_v22 }
 0x127   : > { %592 = vst.msk [vmem:[%s1038_s18 + $0x38] sm:$0xff] %vm584_vm6, %v538_v24 }
 0x12a   : > { %v557_v27 = vpop.f32.mrf.mxu2  ;;  %v575_v28 = vpop.f32.mrf.mxu3 }
 0x12b   : > { %v558_v30 = vadd.f32 %v557_v27, %v453_v25  ;;  %v576_v31 = vadd.f32 %v575_v28, %v460_v26 }
 0x12c   : > { %v525_v33 = vpop.f32.mrf.mxu0 }
 0x12d   : > { %600 = vst.msk [vmem:[%s1038_s18 + $0x78] sm:$0xff] %vm584_vm6, %v558_v30  ;;  %v526_v34 = vadd.f32 %v525_v33, %v440_v29  ;;  %v540_v35 = vpop.f32.mrf.mxu1 }
 0x12e   : > { %607 = vst.msk [vmem:[%s1038_s18 + $0xb0] sm:$0xff] %vm584_vm6, %v576_v31  ;;  %v541_v36 = vadd.f32 %v540_v35, %v446_v32 }
 0x12f   : > { %587 = vst.msk [vmem:[%s1038_s18 + $0x10] sm:$0xff] %vm584_vm6, %v526_v34 }
 0x130   : > { %593 = vst.msk [vmem:[%s1038_s18 + $0x40] sm:$0xff] %vm584_vm6, %v541_v36 }
 0x132   : > { %v560_v39 = vpop.f32.mrf.mxu2  ;;  %v577_v40 = vpop.f32.mrf.mxu3 }
 0x133   : > { %v561_v42 = vadd.f32 %v560_v39, %v454_v37  ;;  %v578_v43 = vadd.f32 %v577_v40, %v461_v38 }
 0x134   : > { %v527_v45 = vpop.f32.mrf.mxu0 }
 0x135   : > { %601 = vst.msk [vmem:[%s1038_s18 + $0x80] sm:$0xff] %vm584_vm6, %v561_v42  ;;  %v528_v46 = vadd.f32 %v527_v45, %v441_v41  ;;  %v542_v47 = vpop.f32.mrf.mxu1 }
 0x136   : > { %608 = vst.msk [vmem:[%s1038_s18 + $0xb8] sm:$0xff] %vm584_vm6, %v578_v43  ;;  %v543_v48 = vadd.f32 %v542_v47, %v447_v44 }
 0x137   : > { %588 = vst.msk [vmem:[%s1038_s18 + $0x18] sm:$0xff] %vm584_vm6, %v528_v46 }
 0x138   : > { %594 = vst.msk [vmem:[%s1038_s18 + $0x48] sm:$0xff] %vm584_vm6, %v543_v48 }
 0x13a   : > { %v562_v51 = vpop.f32.mrf.mxu2  ;;  %v580_v52 = vpop.f32.mrf.mxu3 }
 0x13b   : > { %v563_v54 = vadd.f32 %v562_v51, %v455_v49  ;;  %v581_v55 = vadd.f32 %v580_v52, %v462_v50 }
 0x13c   : > { %v530_v56 = vpop.f32.mrf.mxu0 }
 0x13d   : > { %602 = vst.msk [vmem:[%s1038_s18 + $0x88] sm:$0xff] %vm584_vm6, %v563_v54  ;;  %v531_v57 = vadd.f32 %v530_v56, %v442_v53 }
 0x13e   : > { %609 = vst.msk [vmem:[%s1038_s18 + $0xc0] sm:$0xff] %vm584_vm6, %v581_v55 }
 0x13f   : > { %589 = vst.msk [vmem:[%s1038_s18 + $0x20] sm:$0xff] %vm584_vm6, %v531_v57 }
 0x142   : > { %v565_v59 = vpop.f32.mrf.mxu2  ;;  %v582_v60 = vpop.f32.mrf.mxu3 }
 0x143   : > { %v566_v63 = vadd.f32 %v565_v59, %v456_v58 }
 0x144   : > { %v532_v0 = vpop.f32.mrf.mxu0  ;;  %v545_v1 = vpop.f32.mrf.mxu1 }
 0x145   : > { %603 = vst.msk [vmem:[%s1038_s18 + $0x90] sm:$0xff] %vm584_vm6, %v566_v63  ;;  %v533_v2 = vadd.f32 %v532_v0, %v443_v61  ;;  %v546_v3 = vadd.f32 %v545_v1, %v448_v62 }
 0x147   : > { %590 = vst.msk [vmem:[%s1038_s18 + $0x28] sm:$0xff] %vm584_vm6, %v533_v2 }
 0x148   : > { %595 = vst.msk [vmem:[%s1038_s18 + $0x50] sm:$0xff] %vm584_vm6, %v546_v3 }
 0x14a   : > { %v567_v5 = vpop.f32.mrf.mxu2 }
 0x14b   : > { %v568_v7 = vadd.f32 %v567_v5, %v457_v4 }
 0x14c   : > { %v547_v8 = vpop.f32.mrf.mxu1 }
 0x14d   : > { %604 = vst.msk [vmem:[%s1038_s18 + $0x98] sm:$0xff] %vm584_vm6, %v568_v7  ;;  %v548_v9 = vadd.f32 %v547_v8, %v449_v6 }
 0x14f   : > { %596 = vst.msk [vmem:[%s1038_s18 + $0x58] sm:$0xff] %vm584_vm6, %v548_v9 }
 0x150 PF: > { %s13_s14 = sadd.s32 1, %s889_s14   ;;  %s1175_s12 = smov %s885_s13 }
 0x151   : > { %p10_p5 = scmp.ge.s32.totalorder %s13_s14, 4   ;;  %s1176_s13 = smov %s1178_s15 }
 0x153   :  { %12 = sbr.rel (!%p10_p5) target bundleno = 2 (0x2), region = 65 }

</bundles_post_ra>
